<compile_context>
chip_gen: v6e
topology: v6e:2x2x1
jax: 0.10.0
libtpu: 0.0.40
codegen_flags: <defaults>
</compile_context>

<pallas_src>
import jax
import jax.numpy as jnp
from jax.experimental import pallas as pl
from jax.experimental.pallas import tpu as pltpu

IN_DIM = 28 * 28      # 784  (full last dim of x / first dim of W1 -> no padding needed)
HID_DIM = 64
OUT_DIM = 3

HID_PAD = 128         # hidden 64 -> 128 (lane-dense, MXU-canonical)


def _round_up(n, m):
    return ((n + m - 1) // m) * m


def _encoder_kernel(x_ref, w1_ref, b1_ref, w2_ref, b2_ref, o_ref):
    # x_ref : (TB, 784)  f32/bf16     w1_ref: (784, 128) bf16   b1_ref: (1, 128) f32
    # w2_ref: (128, 128) bf16         b2_ref: (1, 3)     f32    o_ref : (TB, 3)  f32
    x = x_ref[...].astype(jnp.bfloat16)            # in-kernel cast (no-op if already bf16)
    h = jnp.dot(x, w1_ref[...], preferred_element_type=jnp.float32)
    h = jnp.maximum(h + b1_ref[...], 0.0)          # bias + ReLU in f32
    y = jnp.dot(h.astype(jnp.bfloat16), w2_ref[...],
                preferred_element_type=jnp.float32)          # (TB, 128) f32
    o_ref[...] = (y[:, :OUT_DIM] + b2_ref[...]).astype(o_ref.dtype)  # keep real 3 cols only


def prepare_params(w1, b1, w2, b2):
    """Pad/cast parameters once (cache these; do NOT redo per forward call)."""
    w1p = jnp.zeros((IN_DIM, HID_PAD), jnp.bfloat16)
    w1p = w1p.at[:, :HID_DIM].set(w1.astype(jnp.bfloat16))
    b1p = jnp.zeros((1, HID_PAD), jnp.float32)
    b1p = b1p.at[:, :HID_DIM].set(jnp.reshape(b1, (1, HID_DIM)).astype(jnp.float32))
    w2p = jnp.zeros((HID_PAD, HID_PAD), jnp.bfloat16)
    w2p = w2p.at[:HID_DIM, :OUT_DIM].set(w2.astype(jnp.bfloat16))
    b2p = jnp.reshape(b2, (1, OUT_DIM)).astype(jnp.float32)
    return w1p, b1p, w2p, b2p


def encoder_forward(x, params, *, tile_b=None):
    """Fused Linear(784,64) -> ReLU -> Linear(64,3).

    x: (B, 784) f32 (or bf16 for half the HBM read) -> (B, 3) f32.
    params: output of prepare_params().
    """
    w1p, b1p, w2p, b2p = params
    B = x.shape[0]

    # Tile heuristic: aim for ~8 grid steps so the batch axis ("parallel") can
    # shard across v7x's 2 TensorCores with >=2 pipelined steps per core, but
    # cap at 2048 rows (f32 x tile ~6.4 MiB, double-buffered ~13 MiB -> fits
    # v7x's 64 MiB VMEM; also within the 2-4K-row sweet spot on v5e/v6e).
    if tile_b is None:
        tile_b = max(8, min(2048, _round_up(pl.cdiv(B, 8), 8)))
    assert tile_b % 8 == 0

    grid = (pl.cdiv(B, tile_b),)   # partial last block handled by Pallas

    x_bytes = x.size * jnp.dtype(x.dtype).itemsize
    flops = 2 * B * (IN_DIM * HID_PAD + HID_PAD * HID_PAD)
    bytes_accessed = (x_bytes + w1p.size * 2 + w2p.size * 2
                      + b1p.size * 4 + b2p.size * 4 + B * OUT_DIM * 4)

    out = pl.pallas_call(
        _encoder_kernel,
        out_shape=jax.ShapeDtypeStruct((B, OUT_DIM), jnp.float32),
        grid_spec=pltpu.PrefetchScalarGridSpec(
            num_scalar_prefetch=0,
            grid=grid,
            in_specs=[
                pl.BlockSpec((tile_b, IN_DIM), lambda i: (i, 0)),     # x streamed, unpadded
                pl.BlockSpec((IN_DIM, HID_PAD), lambda i: (0, 0)),    # W1 (resident)
                pl.BlockSpec((1, HID_PAD), lambda i: (0, 0)),         # b1
                pl.BlockSpec((HID_PAD, HID_PAD), lambda i: (0, 0)),   # W2
                pl.BlockSpec((1, OUT_DIM), lambda i: (0, 0)),         # b2 (1, 3)
            ],
            out_specs=pl.BlockSpec((tile_b, OUT_DIM), lambda i: (i, 0)),  # write only 3 cols
        ),
        compiler_params=pltpu.CompilerParams(
            dimension_semantics=("parallel",),
            vmem_limit_bytes=40 << 20,   # leaves headroom on v7x's 64 MiB physical VMEM
        ),
        cost_estimate=pl.CostEstimate(
            flops=flops, transcendentals=0, bytes_accessed=bytes_accessed),
    )(x, w1p, b1p, w2p, b2p)

    return out


def init_params(key):
    """Deterministic init mimicking nn.Linear (uniform(-1/sqrt(fan_in), 1/sqrt(fan_in)))."""
    k1, k2, k3, k4 = jax.random.split(key, 4)
    bound1 = 1.0 / jnp.sqrt(IN_DIM)
    bound2 = 1.0 / jnp.sqrt(HID_DIM)
    w1 = jax.random.uniform(k1, (IN_DIM, HID_DIM), jnp.float32, -bound1, bound1)
    b1 = jax.random.uniform(k2, (1, HID_DIM), jnp.float32, -bound1, bound1)
    w2 = jax.random.uniform(k3, (HID_DIM, OUT_DIM), jnp.float32, -bound2, bound2)
    b2 = jax.random.uniform(k4, (1, OUT_DIM), jnp.float32, -bound2, bound2)
    return w1, b1, w2, b2


def _reference_bf16(x, w1, b1, w2, b2):
    """Plain-JAX reference with the same bf16 streaming / f32 accumulation."""
    xb = x.astype(jnp.bfloat16).astype(jnp.float32)
    w1b = w1.astype(jnp.bfloat16).astype(jnp.float32)
    w2b = w2.astype(jnp.bfloat16).astype(jnp.float32)
    h = jnp.maximum(xb @ w1b + b1, 0.0)
    hb = h.astype(jnp.bfloat16).astype(jnp.float32)
    return hb @ w2b + b2


if __name__ == "__main__":
    key = jax.random.PRNGKey(0)
    kx, kp = jax.random.split(key)
    w1, b1, w2, b2 = init_params(kp)
    params = prepare_params(w1, b1, w2, b2)   # padded/cast once, reused per call

    ok = True
    # 32: multi-step grid; 10: exercises the partial (non-divisible) last block.
    for B in (32, 10):
        x = jax.random.normal(jax.random.fold_in(kx, B), (B, IN_DIM), jnp.float32)
        out = jax.block_until_ready(encoder_forward(x, params))

        ref_bf16 = _reference_bf16(x, w1, b1, w2, b2)
        ref_f32 = jnp.maximum(x @ w1 + b1, 0.0) @ w2 + b2

        ok &= out.shape == (B, OUT_DIM)
        ok &= bool(jnp.allclose(out, ref_bf16, atol=1e-3, rtol=1e-3))
        ok &= bool(jnp.allclose(out, ref_f32, atol=5e-2, rtol=5e-2))

    assert ok
    print("KERNEL_OK")
</pallas_src>

<mosaic_0001>
module attributes {stable_mosaic.version = 11 : i64} {
  func.func @_encoder_kernel(%arg0: i32, %arg1: memref<8x784xf32, #tpu.memory_space<vmem>>, %arg2: memref<784x128xbf16, #tpu.memory_space<vmem>>, %arg3: memref<1x128xf32, #tpu.memory_space<vmem>>, %arg4: memref<128x128xbf16, #tpu.memory_space<vmem>>, %arg5: memref<1x3xf32, #tpu.memory_space<vmem>>, %arg6: memref<8x3xf32, #tpu.memory_space<vmem>>) attributes {dimension_semantics = [#tpu.dimension_semantics<parallel>], iteration_bounds = array<i64: 4>, scalar_prefetch = 0 : i64, scratch_operands = 0 : i64, tpu.core_type = #tpu.core_type<tc>, window_params = [{transform_indices = @transform_0, window_bounds = array<i64: 8, 784>}, {pipeline_mode = #tpu.pipeline_mode<synchronous>, transform_indices = @transform_1, window_bounds = array<i64: 784, 128>}, {pipeline_mode = #tpu.pipeline_mode<synchronous>, transform_indices = @transform_2, window_bounds = array<i64: 1, 128>}, {pipeline_mode = #tpu.pipeline_mode<synchronous>, transform_indices = @transform_3, window_bounds = array<i64: 128, 128>}, {pipeline_mode = #tpu.pipeline_mode<synchronous>, transform_indices = @transform_4, window_bounds = array<i64: 1, 3>}, {transform_indices = @transform_5, window_bounds = array<i64: 8, 3>}]} {
    %c0 = arith.constant 0 : index
    %c0_0 = arith.constant 0 : index
    %0 = vector.load %arg1[%c0, %c0_0] : memref<8x784xf32, #tpu.memory_space<vmem>>, vector<8x784xf32>
    %1 = arith.truncf %0 : vector<8x784xf32> to vector<8x784xbf16>
    %c0_1 = arith.constant 0 : index
    %c0_2 = arith.constant 0 : index
    %2 = vector.load %arg2[%c0_1, %c0_2] : memref<784x128xbf16, #tpu.memory_space<vmem>>, vector<784x128xbf16>
    %cst = arith.constant dense<0.000000e+00> : vector<8x128xf32>
    %3 = tpu.matmul %1, %2, %cst {dimension_numbers = #tpu.dot_dimension_numbers<[1], [0], [0], [1], [0, 0, 1, 1], [], []>} : vector<8x784xbf16>, vector<784x128xbf16>, vector<8x128xf32> -> vector<8x128xf32>
    %c0_3 = arith.constant 0 : index
    %c0_4 = arith.constant 0 : index
    %4 = vector.load %arg3[%c0_3, %c0_4] : memref<1x128xf32, #tpu.memory_space<vmem>>, vector<1x128xf32>
    %5 = vector.broadcast %4 : vector<1x128xf32> to vector<8x128xf32>
    %6 = arith.addf %3, %5 : vector<8x128xf32>
    %cst_5 = arith.constant 0.000000e+00 : f32
    %7 = vector.broadcast %cst_5 : f32 to vector<8x128xf32>
    %8 = arith.maximumf %6, %7 : vector<8x128xf32>
    %9 = arith.truncf %8 : vector<8x128xf32> to vector<8x128xbf16>
    %c0_6 = arith.constant 0 : index
    %c0_7 = arith.constant 0 : index
    %10 = vector.load %arg4[%c0_6, %c0_7] : memref<128x128xbf16, #tpu.memory_space<vmem>>, vector<128x128xbf16>
    %cst_8 = arith.constant dense<0.000000e+00> : vector<8x128xf32>
    %11 = tpu.matmul %9, %10, %cst_8 {dimension_numbers = #tpu.dot_dimension_numbers<[1], [0], [0], [1], [0, 0, 1, 1], [], []>} : vector<8x128xbf16>, vector<128x128xbf16>, vector<8x128xf32> -> vector<8x128xf32>
    %12 = vector.extract_strided_slice %11 {offsets = [0, 0], sizes = [8, 3], strides = [1, 1]} : vector<8x128xf32> to vector<8x3xf32>
    %c0_9 = arith.constant 0 : index
    %c0_10 = arith.constant 0 : index
    %13 = vector.load %arg5[%c0_9, %c0_10] : memref<1x3xf32, #tpu.memory_space<vmem>>, vector<1x3xf32>
    %14 = vector.broadcast %13 : vector<1x3xf32> to vector<8x3xf32>
    %15 = arith.addf %12, %14 : vector<8x3xf32>
    %c0_11 = arith.constant 0 : index
    %c0_12 = arith.constant 0 : index
    %16 = vector.load %arg6[%c0_11, %c0_12] : memref<8x3xf32, #tpu.memory_space<vmem>>, vector<8x3xf32>
    tpu.vector_store %arg6[%c0_11, %c0_12], %15 {strides = array<i32>} : memref<8x3xf32, #tpu.memory_space<vmem>>, vector<8x3xf32>,
    return
  }
  func.func @transform_0(%arg0: i32) -> (i32, i32) {
    %c0_i32 = arith.constant 0 : i32
    %c0_i32_0 = arith.constant 0 : i32
    return %arg0, %c0_i32 : i32, i32
  }
  func.func @transform_1(%arg0: i32) -> (i32, i32) {
    %c0_i32 = arith.constant 0 : i32
    %c0_i32_0 = arith.constant 0 : i32
    %c0_i32_1 = arith.constant 0 : i32
    return %c0_i32, %c0_i32_0 : i32, i32
  }
  func.func @transform_2(%arg0: i32) -> (i32, i32) {
    %c0_i32 = arith.constant 0 : i32
    %c0_i32_0 = arith.constant 0 : i32
    %c0_i32_1 = arith.constant 0 : i32
    return %c0_i32, %c0_i32_0 : i32, i32
  }
  func.func @transform_3(%arg0: i32) -> (i32, i32) {
    %c0_i32 = arith.constant 0 : i32
    %c0_i32_0 = arith.constant 0 : i32
    %c0_i32_1 = arith.constant 0 : i32
    return %c0_i32, %c0_i32_0 : i32, i32
  }
  func.func @transform_4(%arg0: i32) -> (i32, i32) {
    %c0_i32 = arith.constant 0 : i32
    %c0_i32_0 = arith.constant 0 : i32
    %c0_i32_1 = arith.constant 0 : i32
    return %c0_i32, %c0_i32_0 : i32, i32
  }
  func.func @transform_5(%arg0: i32) -> (i32, i32) {
    %c0_i32 = arith.constant 0 : i32
    %c0_i32_0 = arith.constant 0 : i32
    return %arg0, %c0_i32 : i32, i32
  }
}

</mosaic_0001>

<bundles_post_ra>
// kernel: tpu_custom_call.1
= control target key start
LH: loop header
LB: loop body
LE: loop exit
PB: predicated region body
PF: predicated region fallthrough
CT: control target
= control target key end

     0   :  { %10 = vsyncpa [#allocation3], 0  ;;  %s1660_s0 = inlined_call_operand.hbm [shape: f32[32,784], index: 0, kind: input, shape index: {}]   ;;  %s1661_s1 = inlined_call_operand.hbm [shape: bf16[784,128], index: 1, kind: input, shape index: {}]   ;;  %s1662_s2 = inlined_call_operand.vmem [shape: f32[1,128], index: 2, kind: input, shape index: {}]   ;;  %s1663_s3 = inlined_call_operand.hbm [shape: bf16[128,128], index: 3, kind: input, shape index: {}]   ;;  %s1664_s4 = inlined_call_operand.vmem [shape: f32[1,3], index: 4, kind: input, shape index: {}]   ;;  %s1665_s5 = inlined_call_operand.vmem [shape: f32[32,3], index: 5, kind: output, shape index: {}]  }
   0x1   :  { %12 = vsyncpa [#allocation3 + $0x1], 0 }
   0x2   :  { %13 = vsyncpa [#allocation5], 0  ;;  %s1504_s18 = smov 0   ;;  %s1506_s19 = smov 0  }
   0x3   :  { %s1508_s20 = smov 0   ;;  %s1510_s21 = smov 0  }
   0x4 LB: > { %s1523_s22 = sadd.s32 4294967295, %s1465_s21   ;;  %p39_p0 = scmp.ne.s32.totalorder %s1457_s19, %s1453_s18  ;;  %s1465_s21 = sphi %s1510_s21, %s1680_s21   ;;  %s1461_s20 = sphi %s1508_s20, %s1679_s20   ;;  %s1457_s19 = sphi %s1506_s19, %s1678_s19   ;;  %s1453_s18 = sphi %s1504_s18, %s1677_s18  }
   0x5   : > { %p1666_p1 = scmp.eq.s32.totalorder %s1523_s22, 0  ;;  %p1049_p2 = scmp.ge.s32.totalorder %s1465_s21, 1 }
   0x6   : > { %p160_p3 = scmp.lt.s32.totalorder %s1465_s21, 5  ;;  %s1467_s25 = smov [#allocation4]  }
   0x7   : > { %p1531_p4 = por %p1666_p1, %p39_p0  ;;  %s172_s26 = sshll.u32 %s1467_s25, 4  ;;  %s173_s26 = int_to_ptr.vmem [resolvable:$true] %s172_s26 }
   0x8   : > { %p1535_p5 = pnand %p1049_p2, %p160_p3  ;;  %s1468_s28 = smov [#allocation6]  }
   0x9   : > { %s1669_s23 = scalar_select %p1531_p4, 1, 0 }
   0xa   : > { %s1670_s24 = scalar_select %p1535_p5, 1, 0 }
   0xb   : > { %p1236_p6 = pneg %p1535_p5  ;;  %s188_s29 = sshll.u32 %s1468_s28, 4  ;;  %s189_s29 = int_to_ptr.vmem [resolvable:$true] %s188_s29 }
   0xc   : > { %s1358_s30 = scalar_lea.vmem %s173_s26, 6272  ;;  %p1366_p12 = scmp.lt.s32.totalorder %s173_s26, %s173_s26 }
   0xd   : > { %p1543_p7 = pnand %p1236_p6, %p1666_p1  ;;  %p1359_p9 = scmp.ne.s32.totalorder %s173_s26, %s1358_s30 }
   0xe   : > { %p1367_p13 = scmp.lt.s32.totalorder %s1358_s30, %s1358_s30 }
   0xf   : > { %p1349_p8 = pneg %p1543_p7 }
  0x10   : > { %p1368_p0 = por %p1367_p13, %p1366_p12 }
  0x11   : > { %p1361_p10 = pnand %p1359_p9, %p1349_p8 }
  0x13   : > { %p1362_p11 = pneg %p1361_p10 }
  0x15   : > { %p1369_p2 = pnand %p1368_p0, %p1362_p11 }
  0x17   : > { %1372 = shalt.err (!%p1369_p2)
}
  0x18   : > { %s1469_s6 = smov 64   ;;  %s1470_s7 = smov 4  }
  0x19   : > { %1239 = dma.hbm_to_vmem [thread:$0]  (!%p1543_p7), %s1661_s1, 6272, %s173_s26, [#allocation5], %s1469_s6, %s1469_s6, %s1470_s7  }
  0x1a   : > { %s1384_s10 = scalar_lea.vmem %s189_s29, 1024  ;;  %p1392_p10 = scmp.lt.s32.totalorder %s189_s29, %s189_s29 }
  0x1b   : > { %p1385_p3 = scmp.ne.s32.totalorder %s189_s29, %s1384_s10  ;;  %p1393_p1 = scmp.lt.s32.totalorder %s1384_s10, %s1384_s10 }
  0x1d   : > { %p1387_p6 = pnand %p1385_p3, %p1349_p8  ;;  %p1394_p12 = por %p1393_p1, %p1392_p10 }
  0x1f   : > { %p1388_p9 = pneg %p1387_p6 }
  0x21   : > { %p1395_p11 = pnand %p1394_p12, %p1388_p9 }
  0x23   : > { %1398 = shalt.err (!%p1395_p11)
}
  0x24   : > { %1242 = dma.hbm_to_vmem [thread:$0]  (!%p1543_p7), %s1663_s3, 1024, %s189_s29, [#allocation5], %s1469_s6, %s1469_s6, %s1470_s7  }
  0x25   : > { %s1566_s13 = sadd.s32 1, %s1465_s21   ;;  %s26_s14 = sadd.s32 1, %s1461_s20 }
  0x26   : > { %s23_s15 = ssub.s32 %s1465_s21, %s1566_s13  ;;  %p33_p1 = scmp.ne.s32.totalorder %s1461_s20, %s1457_s19 }
  0x27   : > { %p24_p8 = scmp.eq.s32.totalorder %s23_s15, 0  ;;  %p34_p13 = scmp.eq.s32.totalorder %s1465_s21, 0 }
  0x28   : > { %p1249_p0 = scmp.lt.s32.totalorder %s1465_s21, 4  ;;  %s205_s16 = sand.u32 1, %s1461_s20  }
  0x29   : > { %s1577_s17 = scalar_select %p24_p8, %s1461_s20, %s26_s14  }
  0x2a   : > { %p35_p2 = por %p34_p13, %p33_p1  ;;  %s1223_s18 = smul.u32 56, %s205_s16 }
  0x2b   : > { %s1224_s25 = smul.u32 896, %s1465_s21  ;;  %s206_s7 = scalar_lea.sflag [#allocation3], %s205_s16 }
  0x2c   : > { %p1580_p3 = pnand %p1249_p0, %p35_p2  ;;  %s209_s30 = scalar_lea.vmem [#allocation2], %s1223_s18 }
  0x2d   : > { %s1587_s29 = scalar_lea.hbm %s1660_s0, %s1224_s25  ;;  %s217_s6 = sshll.u32 %s209_s30, 4  ;;  %s218_s6 = int_to_ptr.vmem [resolvable:$true] %s217_s6 }
  0x2e   : > { %s1399_s8 = scalar_lea.hbm %s1587_s29, 896  ;;  %p1401_p6 = pneg %p1580_p3 }
  0x2f   : > { %p1400_p7 = scmp.ne.s32.totalorder %s1587_s29, %s1399_s8  ;;  %s1404_s10 = scalar_lea.hbm %s1660_s0, 3584 }
  0x30   : > { %p1405_p12 = scmp.lt.s32.totalorder %s1587_s29, %s1660_s0  ;;  %p1406_p11 = scmp.lt.s32.totalorder %s1404_s10, %s1399_s8 }
  0x31   : > { %p1402_p9 = pnand %p1401_p6, %p1400_p7 }
  0x32   : > { %p1407_p1 = por %p1406_p11, %p1405_p12 }
  0x33   : > { %p1403_p10 = pneg %p1402_p9 }
  0x35   : > { %p1408_p8 = pnand %p1407_p1, %p1403_p10 }
  0x37   : > { %1411 = shalt.err (!%p1408_p8)
}
  0x38   : > { %s1412_s14 = scalar_lea.vmem %s218_s6, 896  ;;  %s1471_s15 = smov [#allocation2]  }
  0x39   : > { %p1413_p13 = scmp.ne.s32.totalorder %s218_s6, %s1412_s14  ;;  %s1417_s16 = sshll.u32 %s1471_s15, 4  ;;  %s1418_s16 = int_to_ptr.vmem [resolvable:$false] %s1417_s16 }
  0x3a   : > { %s1419_s18 = scalar_lea.vmem %s1418_s16, 1792  ;;  %p1420_p7 = scmp.lt.s32.totalorder %s218_s6, %s1418_s16 }
  0x3b   : > { %p1415_p0 = pnand %p1413_p13, %p1401_p6  ;;  %p1421_p9 = scmp.lt.s32.totalorder %s1419_s18, %s1412_s14 }
  0x3d   : > { %p1416_p2 = pneg %p1415_p0  ;;  %p1422_p4 = por %p1421_p9, %p1420_p7 }
  0x3f   : > { %p1423_p5 = pnand %p1422_p4, %p1416_p2 }
  0x41   : > { %1426 = shalt.err (!%p1423_p5)
}
  0x42   : > { %1246 = dma.hbm_to_vmem [thread:$0]  (!%p1580_p3), %s1587_s29, 896, %s218_s6, %s206_s7  }
  0x43   : > { %p1673_p10 = scmp.ne.s32.totalorder %s1670_s24, 0 }
  0x44   : > { %s228_s25 = sand.u32 (!%p1673_p10), 1, %s1457_s19   ;;  %p1674_p6 = scmp.ne.s32.totalorder (!%p1673_p10), %s1669_s23, 0 }
  0x45   : > { %226 = sbr.rel (%p1673_p10) target bundleno = 547 (0x223), region = 40  ;;  %s229_s28 = scalar_lea.sflag (!%p1673_p10), [#allocation3], %s228_s25 }
  0x46   : > { %s1225_s27 = smul.u32 (!%p1673_p10), 56, %s228_s25 }
  0x48   : > { %s1606_s30 = scalar_lea.vmem (!%p1673_p10), [#allocation2], %s1225_s27 }
  0x4a   : > { %1444 = dma.done.wait (%p1674_p6), %s229_s28, 896  }
  0x4b   : > { %1446 = vsyncadd (%p1674_p6), %s229_s28, 4294966400  ;;  %p1675_p4 = scmp.eq.s32.totalorder %s1523_s22, 0 }
  0x4d   : > { %1448 = dma.done.wait (%p1675_p4), [#allocation5], 7296   ;;  %p1676_p5 = pmov %p1675_p4 }
  0x4e   : > { %v1290_v0 = vld [vmem:[#allocation4 + $0x78] sm:$0xff]   ;;  %v1294_v4 = vld [vmem:[#allocation4 + $0x70] sm:$0xff]   ;;  %v1298_v8 = vld [vmem:[#allocation4 + $0x68] sm:$0xff]   ;;  %v1472_v44 = vmov 0.0   ;;  %vm1473_vm0 = vmmov 0   ;;  %vm684_vm1 = vcmask 130048  }
  0x4f   : > { %1450 = vsyncadd (%p1676_p5), [#allocation5], 4294960000  ;;  %v1291_v1 = vld [vmem:[#allocation4 + $0x38] sm:$0xff]   ;;  %1120 = vmatprep.subr.bf16.mxu0 %v1290_v0  ;;  %v1295_v5 = vld [vmem:[#allocation4 + $0x30] sm:$0xff]   ;;  %p266_p3 = scmp.lt.s32.totalorder %s1523_s22, 3  ;;  %vm962_vm2 = vcmask 23552  }
  0x50   : > { %v1292_v2 = vld [vmem:[#allocation4 + $0xf8] sm:$0xff]   ;;  %1121 = vmatpush3.bf16.msra.mxu0 %v1291_v1  ;;  %v1296_v6 = vld [vmem:[#allocation4 + $0xf0] sm:$0xff]   ;;  %v1299_v9 = vld [vmem:[#allocation4 + $0x28] sm:$0xff]  }
  0x51   : > { %v1293_v3 = vld [vmem:[#allocation4 + $0xb8] sm:$0xff]   ;;  %1142 = vmatprep.subr.bf16.mxu1 %v1292_v2  ;;  %1122 = vmatprep.subr.bf16.mxu0 %v1294_v4  ;;  %v1297_v7 = vld [vmem:[#allocation4 + $0xb0] sm:$0xff]   ;;  %v1300_v10 = vld [vmem:[#allocation4 + $0xe8] sm:$0xff]   ;;  %s1682_s22 = smov (!%p266_p3, %s1523_s22), 3 }
  0x52   : > { %1143 = vmatpush3.bf16.msra.mxu1 %v1293_v3  ;;  %v1301_v11 = vld [vmem:[#allocation4 + $0xa8] sm:$0xff]   ;;  %v1302_v12 = vld [vmem:[#allocation4 + $0x60] sm:$0xff]   ;;  %v1306_v16 = vld [vmem:[#allocation4 + $0x58] sm:$0xff]   ;;  %s1057_s26 = sshll.u32 %s1682_s22, 3 }
  0x53   : > { %1144 = vmatprep.subr.bf16.mxu1 %v1296_v6  ;;  %v1303_v13 = vld [vmem:[#allocation4 + $0x20] sm:$0xff]   ;;  %v1307_v17 = vld [vmem:[#allocation4 + $0x18] sm:$0xff]   ;;  %v1310_v20 = vld [vmem:[#allocation4 + $0x50] sm:$0xff]   ;;  %s269_s21 = scalar_lea.vmem %s1665_s5, %s1057_s26 }
  0x54   : > { %1123 = vmatpush3.bf16.msra.mxu0 %v1295_v5  ;;  %v1304_v14 = vld [vmem:[#allocation4 + $0xe0] sm:$0xff]   ;;  %v1308_v18 = vld [vmem:[#allocation4 + $0xd8] sm:$0xff]   ;;  %v1311_v21 = vld [vmem:[#allocation4 + $0x10] sm:$0xff]  }
  0x55   : > { %1124 = vmatprep.subr.bf16.mxu0 %v1298_v8  ;;  %v1305_v15 = vld [vmem:[#allocation4 + $0xa0] sm:$0xff]   ;;  %v1309_v19 = vld [vmem:[#allocation4 + $0x98] sm:$0xff]   ;;  %v1312_v22 = vld [vmem:[#allocation4 + $0xd0] sm:$0xff]  }
  0x56   : > { %1145 = vmatpush3.bf16.msra.mxu1 %v1297_v7  ;;  %v1313_v23 = vld [vmem:[#allocation4 + $0x90] sm:$0xff]   ;;  %v1314_v24 = vld [vmem:[#allocation4 + $0x48] sm:$0xff]   ;;  %v1318_v28 = vld [vmem:[#allocation4 + $0x40] sm:$0xff]  }
  0x57   : > { %1146 = vmatprep.subr.bf16.mxu1 %v1300_v10  ;;  %v1315_v25 = vld [vmem:[#allocation4 + $0x8] sm:$0xff]   ;;  %v1319_v29 = vld [vmem:[#allocation4] sm:$0xff]   ;;  %v272_v31 = vld [vmem:[%s1606_s30 + $0x8] sm:$0xff] }
  0x58   : > { %1125 = vmatpush3.bf16.msra.mxu0 %v1299_v9  ;;  %v1316_v26 = vld [vmem:[#allocation4 + $0xc8] sm:$0xff]   ;;  %v1320_v30 = vld [vmem:[#allocation4 + $0xc0] sm:$0xff]   ;;  %v279_v32 = vpack.c.bf16 %v272_v31, %v272_v31  ;;  %v1322_v36 = vld [vmem:[#allocation4 + $0x178] sm:$0xff]  }
  0x59   : > { %1126 = vmatprep.subr.bf16.mxu0 %v1302_v12  ;;  %v1317_v27 = vld [vmem:[#allocation4 + $0x88] sm:$0xff]   ;;  %v1321_v33 = vld [vmem:[#allocation4 + $0x80] sm:$0xff]   ;;  %v1323_v39 = vld [vmem:[#allocation4 + $0x138] sm:$0xff]  }
  0x5a   : > { %1147 = vmatpush3.bf16.msra.mxu1 %v1301_v11  ;;  %v271_v34 = vld [vmem:[%s1606_s30] sm:$0xff]  ;;  %v274_v37 = vld [vmem:[%s1606_s30 + $0x18] sm:$0xff]  ;;  %720 = vmatprep.mubr.bf16.mxu0 %v279_v32  ;;  %v273_v40 = vld [vmem:[%s1606_s30 + $0x10] sm:$0xff] }
  0x5b   : > { %1148 = vmatprep.subr.bf16.mxu1 %v1304_v14  ;;  %v278_v35 = vpack.c.bf16 %v271_v34, %v271_v34  ;;  %v281_v38 = vpack.c.bf16 %v274_v37, %v274_v37  ;;  %v280_v41 = vpack.c.bf16 %v273_v40, %v273_v40  ;;  %v1324_v42 = vld [vmem:[#allocation4 + $0x170] sm:$0xff]   ;;  %v1326_v45 = vld [vmem:[#allocation4 + $0x168] sm:$0xff]   ;;  %v1328_v47 = vld [vmem:[#allocation4 + $0x160] sm:$0xff]  }
  0x5c   : > { %1127 = vmatpush3.bf16.msra.mxu0 %v1303_v13  ;;  %v1325_v43 = vld [vmem:[#allocation4 + $0x130] sm:$0xff]   ;;  %v1327_v46 = vld [vmem:[#allocation4 + $0x128] sm:$0xff]   ;;  %v1329_v48 = vld [vmem:[#allocation4 + $0x120] sm:$0xff]  }
  0x5d   : > { %1128 = vmatprep.subr.bf16.mxu0 %v1306_v16  ;;  %760 = vmatprep.mubr.bf16.mxu1 %v281_v38  ;;  %v1330_v49 = vld [vmem:[#allocation4 + $0x158] sm:$0xff]   ;;  %v1332_v51 = vld [vmem:[#allocation4 + $0x150] sm:$0xff]   ;;  %v1338_v53 = vld [vmem:[#allocation4 + $0x180] sm:$0xff]  }
  0x5e   : > { %1149 = vmatpush3.bf16.msra.mxu1 %v1305_v15  ;;  %v1331_v50 = vld [vmem:[#allocation4 + $0x118] sm:$0xff]   ;;  %v1333_v52 = vld [vmem:[#allocation4 + $0x110] sm:$0xff]   ;;  %v1334_v55 = vld [vmem:[#allocation4 + $0x148] sm:$0xff]  }
  0x5f   : > { %1150 = vmatprep.subr.bf16.mxu1 %v1308_v18  ;;  %v276_v54 = vld [vmem:[%s1606_s30 + $0x28] sm:$0xff]  ;;  %v277_v57 = vld [vmem:[%s1606_s30 + $0x30] sm:$0xff]  ;;  %v1335_v59 = vld [vmem:[#allocation4 + $0x108] sm:$0xff]  }
  0x60   : > { %1129 = vmatpush3.bf16.msra.mxu0 %v1307_v17  ;;  %v283_v56 = vpack.c.bf16 %v276_v54, %v276_v54  ;;  %v284_v58 = vpack.c.bf16 %v277_v57, %v277_v57  ;;  %v1336_v60 = vld [vmem:[#allocation4 + $0x140] sm:$0xff]   ;;  %v275_v62 = vld [vmem:[%s1606_s30 + $0x20] sm:$0xff]  ;;  %v1340_v1 = vld [vmem:[#allocation6 + $0x30] sm:$0xff]  }
  0x61   : > { %1130 = vmatprep.subr.bf16.mxu0 %v1310_v20  ;;  %v1337_v61 = vld [vmem:[#allocation4 + $0x100] sm:$0xff]   ;;  %v282_v63 = vpack.c.bf16 %v275_v62, %v275_v62  ;;  %v1341_v2 = vld [vmem:[#allocation6 + $0x28] sm:$0xff]   ;;  %v1342_v3 = vld [vmem:[#allocation6 + $0x20] sm:$0xff]  }
  0x62   : > { %1151 = vmatpush3.bf16.msra.mxu1 %v1309_v19  ;;  %v1339_v0 = vld [vmem:[#allocation6 + $0x38] sm:$0xff]   ;;  %v1344_v5 = vld [vmem:[#allocation6 + $0x10] sm:$0xff]   ;;  %v1345_v6 = vld [vmem:[#allocation6 + $0x8] sm:$0xff]  }
  0x63   : > { %1152 = vmatprep.subr.bf16.mxu1 %v1312_v22  ;;  %v1343_v4 = vld [vmem:[#allocation6 + $0x18] sm:$0xff]   ;;  %v1346_v7 = vld [vmem:[#allocation6] sm:$0xff]   ;;  %v1117_v34 = vld [vmem:[%s1664_s4] ss:$0 sm:$0xff] }
  0x64   : > { %1131 = vmatpush3.bf16.msra.mxu0 %v1311_v21  ;;  %v1058_v21 = vld [vmem:[%s1662_s2] ss:$0 sm:$0xff] }
  0x65   : > { %1132 = vmatprep.subr.bf16.mxu0 %v1314_v24 }
  0x66   : > { %1153 = vmatpush3.bf16.msra.mxu1 %v1313_v23 }
  0x67   : > { %1154 = vmatprep.subr.bf16.mxu1 %v1316_v26 }
  0x68   : > { %1133 = vmatpush3.bf16.msra.mxu0 %v1315_v25 }
  0x69   : > { %1134 = vmatprep.subr.bf16.mxu0 %v1318_v28 }
  0x6a   : > { %1155 = vmatpush3.bf16.msra.mxu1 %v1317_v27 }
  0x6b   : > { %1156 = vmatprep.subr.bf16.mxu1 %v1320_v30 }
  0x6c   : > { %1135 = vmatpush3.bf16.msra.mxu0 %v1319_v29 }
  0x6d   : > { %1164 = vmatprep.subr.bf16.mxu0 %v1322_v36 }
  0x6e   : > { %1157 = vmatpush3.bf16.msra.mxu1 %v1321_v33 }
  0x6f   : > { %721 = vmatmul.mubr.bf16.vlgmr.msra.gmra.mxu0 %v278_v35  ;;  %1197 = vmatprep.subr.bf16.mxu1 %v1472_v44 }
  0x70   : > { %1165 = vmatpush3.bf16.msra.mxu0 %v1323_v39  ;;  %800 = vmatprep.mubr.bf16.mxu0 %v283_v56 }
  0x71   : > { %761 = vmatmul.mubr.bf16.vlgmr.msra.gmra.mxu1 %v280_v41  ;;  %1166 = vmatprep.subr.bf16.mxu0 %v1324_v42 }
  0x72   : > { %1199 = vmatprep.mubr.msk.bf16.mxu1 %vm1473_vm0, %v1472_v44  ;;  %1198 = vmatpush3.bf16.msra.mxu1 %v1338_v53 }
  0x73   : > { %1203 = vmatprep.subr.bf16.mxu1 %v1472_v44 }
  0x74   : > { %1167 = vmatpush3.bf16.msra.mxu0 %v1325_v43 }
  0x75   : > { %1168 = vmatprep.subr.bf16.mxu0 %v1326_v45 }
  0x78   : > { %1169 = vmatpush3.bf16.msra.mxu0 %v1327_v46 }
  0x79   : > { %1170 = vmatprep.subr.bf16.mxu0 %v1328_v47  ;;  %1200 = vmatmul.mubr.msk.bf16.vlgmr.msra.gmra.mxu1 %vm684_vm1, %v284_v58 }
  0x7a   : > { %1219 = vmatprep.mubr.msk.bf16.mxu1 %vm1473_vm0, %v1472_v44  ;;  %1204 = vmatpush3.bf16.msra.mxu1 %v1339_v0 }
  0x7b   : > { %1205 = vmatprep.subr.bf16.mxu1 %v1472_v44 }
  0x7c   : > { %1171 = vmatpush3.bf16.msra.mxu0 %v1329_v48 }
  0x7d   : > { %1172 = vmatprep.subr.bf16.mxu0 %v1330_v49 }
  0x7e   : > { %1206 = vmatpush3.bf16.msra.mxu1 %v1340_v1 }
  0x7f   : > { %1207 = vmatprep.subr.bf16.mxu1 %v1472_v44 }
  0x80   : > { %1173 = vmatpush3.bf16.msra.mxu0 %v1331_v50 }
  0x81   : > { %1174 = vmatprep.subr.bf16.mxu0 %v1332_v51 }
  0x82   : > { %1208 = vmatpush3.bf16.msra.mxu1 %v1341_v2 }
  0x83   : > { %1209 = vmatprep.subr.bf16.mxu1 %v1472_v44 }
  0x84   : > { %1175 = vmatpush3.bf16.msra.mxu0 %v1333_v52 }
  0x85   : > { %1176 = vmatprep.subr.bf16.mxu0 %v1334_v55 }
  0x86   : > { %1210 = vmatpush3.bf16.msra.mxu1 %v1342_v3 }
  0x87   : > { %1211 = vmatprep.subr.bf16.mxu1 %v1472_v44 }
  0x88   : > { %1177 = vmatpush3.bf16.msra.mxu0 %v1335_v59 }
  0x89   : > { %1178 = vmatprep.subr.bf16.mxu0 %v1336_v60 }
  0x8a   : > { %1212 = vmatpush3.bf16.msra.mxu1 %v1343_v4 }
  0x8b   : > { %1213 = vmatprep.subr.bf16.mxu1 %v1472_v44 }
  0x8c   : > { %1179 = vmatpush3.bf16.msra.mxu0 %v1337_v61 }
  0x8e   : > { %1214 = vmatpush3.bf16.msra.mxu1 %v1344_v5 }
  0x8f   : > { %801 = vmatmul.mubr.bf16.vlgmr.msra.gmra.mxu0 %v282_v63  ;;  %1215 = vmatprep.subr.bf16.mxu1 %v1472_v44 }
  0x92   : > { %1216 = vmatpush3.bf16.msra.mxu1 %v1345_v6 }
  0x93   : > { %1217 = vmatprep.subr.bf16.mxu1 %v1472_v44 }
  0x96   : > { %1218 = vmatpush3.bf16.msra.mxu1 %v1346_v7 }
 0x12f   : > { %v1136_v8 = vpop.f32.mrf.mxu0 }
 0x131   : > { %v1137_v9 = vpop.f32.mrf.mxu0  ;;  %v1158_v10 = vpop.f32.mrf.mxu1 }
 0x132   : > { %v1138_v20 = vadd.f32 %v1137_v9, %v1136_v8 }
 0x133   : > { %v1139_v11 = vpop.f32.mrf.mxu0  ;;  %v1159_v12 = vpop.f32.mrf.mxu1 }
 0x134   : > { %v723_v22 = vadd.f32 %v1138_v20, %v1058_v21  ;;  %v1160_v23 = vadd.f32 %v1159_v12, %v1158_v10 }
 0x135   : > { %v1140_v13 = vpop.f32.mrf.mxu0  ;;  %v1161_v14 = vpop.f32.mrf.mxu1 }
 0x136   : > { %v763_v26 = vadd.f32 %v1160_v23, %v723_v22 }
 0x137   : > { %v1162_v15 = vpop.f32.mrf.mxu1 }
 0x139   : > { %v842_v16 = vpop.f32.mrf.mxu1 }
 0x13b   : > { %v1201_v17 = vpop.f32.mrf.mxu1 }
 0x13d   : > { %v845_v18 = vpop.f32.mrf.mxu1 }
 0x13f   : > { %v1202_v19 = vpop.f32.mrf.mxu1 }
 0x14f   : > { %v1180_v24 = vpop.f32.mrf.mxu0 }
 0x151   : > { %v1181_v25 = vpop.f32.mrf.mxu0 }
 0x152   : > { %v1182_v27 = vadd.f32 %v1181_v25, %v1180_v24 }
 0x153   : > { %v1183_v28 = vpop.f32.mrf.mxu0 }
 0x154   : > { %v803_v29 = vadd.f32 %v1182_v27, %v763_v26 }
 0x155   : > { %v1184_v30 = vpop.f32.mrf.mxu0 }
 0x156   : > { %v843_v31 = vadd.f32 %v842_v16, %v803_v29 }
 0x158   : > { %v848_v32 = vmax.f32 %v843_v31, 0.0 }
 0x15a   : > { %v849_v33 = vpack.c.bf16 %v848_v32, %v848_v32 }
 0x15c   : > { %1220 = vmatmul.mubr.bf16.vlgmr.msra.gmra.mxu1 %v849_v33 }
 0x21c   : > { %v948_v35 = vpop.f32.mrf.mxu1 }
 0x21d   : > { %v961_v36 = vadd.f32 %v1117_v34, %v948_v35 }
 0x21e   : > { %v1221_v37 = vpop.f32.mrf.mxu1 }
 0x21f   : > { %963 = vst.msk [vmem:[%s269_s21] sm:$0xff] %vm962_vm2, %v961_v36 }
 0x220   : > { %v951_v38 = vpop.f32.mrf.mxu1 }
 0x222   : > { %v1222_v39 = vpop.f32.mrf.mxu1 }
 0x223 PF: > { %p16_p12 = scmp.ge.s32.totalorder %s1566_s13, 6   ;;  %s1677_s18 = smov %s1457_s19 }
 0x224   : > { %s1678_s19 = smov %s1461_s20  ;;  %s1679_s20 = smov %s1577_s17 }
 0x225   : > { %s1680_s21 = smov %s1566_s13  ;;  %18 = sbr.rel (!%p16_p12) target bundleno = 4 (0x4), region = 88 }
 0x22a   :  { %983 = vsyncpa [#allocation3], 1 }
 0x22b   :  { %985 = vsyncpa [#allocation3 + $0x1], 1 }
 0x22c   :  { %986 = vsyncpa [#allocation5], 1 }

</bundles_post_ra>
